<compile_context>
chip_gen: v5e
topology: v5e:2x2
jax: 0.10.0
libtpu: 0.0.40
codegen_flags: <defaults>
</compile_context>

<pallas_src>
import functools
import math

import jax
import jax.numpy as jnp
from jax.experimental import pallas as pl
from jax.experimental.pallas import tpu as pltpu

NEG_SLOPE = 0.01  # F.leaky_relu default negative_slope


def _leaky_relu(x):
    # Identical to leaky_relu for 0 < slope < 1; cheaper than where(cmp, ..).
    return jnp.maximum(x, NEG_SLOPE * x)


def _round_up(n, m):
    return ((n + m - 1) // m) * m


def mlp_kernel(x_ref,
               w1_ref, b1_ref,
               w2_ref, b2_ref,
               w3_ref, b3_ref,
               w4_ref, b4_ref,
               o_ref):
    """One batch-tile of the MLP. Weights (bf16) are VMEM-resident across the grid."""
    h = x_ref[...].astype(jnp.bfloat16)

    h = jnp.dot(h, w1_ref[...], preferred_element_type=jnp.float32) + b1_ref[...]
    h = _leaky_relu(h)
    # TODO(synk): dropout(p=0.5) is identity in eval mode; training mode would need
    # pltpu.prng_seed + pltpu.prng_random_bits and a separate kernel path.

    h = jnp.dot(h.astype(jnp.bfloat16), w2_ref[...],
                preferred_element_type=jnp.float32) + b2_ref[...]
    h = _leaky_relu(h)

    h = jnp.dot(h.astype(jnp.bfloat16), w3_ref[...],
                preferred_element_type=jnp.float32) + b3_ref[...]
    h = _leaky_relu(h)

    if w4_ref.shape[0] == 1:
        # output_dim == 1: wrapper passes w4 transposed as [1, 64]; do the final
        # layer as a lane-wise reduction rather than an N=1 MXU matmul.
        w4_row = w4_ref[...].astype(jnp.float32)                    # [1, 64]
        h = jnp.sum(h * w4_row, axis=-1, keepdims=True) + b4_ref[...]
    else:
        h = jnp.dot(h.astype(jnp.bfloat16), w4_ref[...],
                    preferred_element_type=jnp.float32) + b4_ref[...]
    h = _leaky_relu(h)
    o_ref[...] = jnp.tanh(h).astype(o_ref.dtype)


@functools.partial(jax.jit, static_argnames=("tile_b",))
def mlp_forward(x, params, *, tile_b=512):
    """x: [B, input_dim] float32. params: dict of f32 (W [in,out], b [1,out]) per layer."""
    batch, input_dim = x.shape
    out_dim = params["w4"].shape[1]

    # bf16 weights (MXU-native), f32 biases.
    w1 = params["w1"].astype(jnp.bfloat16)
    w2 = params["w2"].astype(jnp.bfloat16)
    w3 = params["w3"].astype(jnp.bfloat16)
    if out_dim == 1:
        w4 = params["w4"].astype(jnp.bfloat16).T        # [1, 64] lane-dense row
    else:
        w4 = params["w4"].astype(jnp.bfloat16)
    b1, b2, b3, b4 = (params[f"b{i}"] for i in range(1, 5))

    # Batch tile: biggest tile <= tile_b that's a multiple of 8 sublanes.
    # tile_b=512 keeps resident weights (~0.33 MB) + double-buffered x/out tiles +
    # the 512-wide layer-1 intermediate comfortably under v7x's 32 MiB scoped VMEM.
    tb = min(tile_b, _round_up(batch, 8))
    padded = _round_up(batch, tb)
    x_p = x if padded == batch else jnp.pad(x, ((0, padded - batch), (0, 0)))

    grid = (padded // tb,)

    def tile_spec(shape):
        return pl.BlockSpec(shape, lambda i: (i, 0))

    def resident_spec(arr):
        # Whole array as one block, same block index every step -> stays in VMEM.
        return pl.BlockSpec(arr.shape, lambda i: (0, 0))

    weight_args = (w1, b1, w2, b2, w3, b3, w4, b4)

    out = pl.pallas_call(
        mlp_kernel,
        out_shape=jax.ShapeDtypeStruct((padded, out_dim), jnp.float32),
        grid=grid,
        in_specs=[tile_spec((tb, input_dim))] + [resident_spec(a) for a in weight_args],
        out_specs=tile_spec((tb, out_dim)),
        compiler_params=pltpu.CompilerParams(
            dimension_semantics=("parallel",)),  # v7x: shard batch tiles over both TCs
    )(x_p, *weight_args)

    return out[:batch]


def xavier_uniform(key, fan_in, fan_out, dtype=jnp.float32):
    # Matches torch.nn.init.xavier_uniform_ (gain=1): U(-a, a), a = sqrt(6/(fan_in+fan_out)).
    a = math.sqrt(6.0 / (fan_in + fan_out))
    return jax.random.uniform(key, (fan_in, fan_out), dtype=dtype, minval=-a, maxval=a)


def init_mlp_params(key, input_dim, output_dim=1):
    dims = [(input_dim, 512), (512, 256), (256, 64), (64, output_dim)]
    keys = jax.random.split(key, len(dims))
    params = {}
    for i, ((fi, fo), k) in enumerate(zip(dims, keys), start=1):
        params[f"w{i}"] = xavier_uniform(k, fi, fo)
        params[f"b{i}"] = jnp.full((1, fo), 0.01, dtype=jnp.float32)  # constant_(bias, 0.01)
    return params


def mlp_reference_f32(x, params):
    """Pure-f32 reference (PyTorch-equivalent math)."""
    h = x
    for i in range(1, 5):
        h = h @ params[f"w{i}"] + params[f"b{i}"]
        h = _leaky_relu(h)
    return jnp.tanh(h)


def mlp_reference_bf16(x, params):
    """Reference mirroring the kernel's dtype strategy (bf16 operands, f32 accum)."""
    h = x
    for i in range(1, 5):
        h = jnp.dot(h.astype(jnp.bfloat16), params[f"w{i}"].astype(jnp.bfloat16),
                    preferred_element_type=jnp.float32) + params[f"b{i}"]
        h = _leaky_relu(h)
    return jnp.tanh(h)


if __name__ == "__main__":
    key = jax.random.PRNGKey(0)
    k_param, k_x1, k_x2 = jax.random.split(key, 3)

    input_dim, output_dim = 32, 1
    params = init_mlp_params(k_param, input_dim, output_dim)

    # Small single-tile case.
    x_small = jax.random.normal(k_x1, (8, input_dim), dtype=jnp.float32)
    out_small = jax.block_until_ready(mlp_forward(x_small, params))
    assert out_small.shape == (8, output_dim)
    assert jnp.allclose(out_small, mlp_reference_bf16(x_small, params), atol=1e-2, rtol=1e-2)
    assert jnp.allclose(out_small, mlp_reference_f32(x_small, params), atol=5e-2, rtol=5e-2)

    # Multi-tile case exercising the batch grid (3 tiles) and the padding path.
    x_big = jax.random.normal(k_x2, (44, input_dim), dtype=jnp.float32)
    out_big = jax.block_until_ready(mlp_forward(x_big, params, tile_b=16))
    assert out_big.shape == (44, output_dim)
    assert jnp.allclose(out_big, mlp_reference_bf16(x_big, params), atol=1e-2, rtol=1e-2)

    print("KERNEL_OK")
</pallas_src>

<mosaic_0001>
module attributes {stable_mosaic.version = 11 : i64} {
  func.func @mlp_kernel(%arg0: i32, %arg1: memref<8x32xf32, #tpu.memory_space<vmem>>, %arg2: memref<32x512xbf16, #tpu.memory_space<vmem>>, %arg3: memref<1x512xf32, #tpu.memory_space<vmem>>, %arg4: memref<512x256xbf16, #tpu.memory_space<vmem>>, %arg5: memref<1x256xf32, #tpu.memory_space<vmem>>, %arg6: memref<256x64xbf16, #tpu.memory_space<vmem>>, %arg7: memref<1x64xf32, #tpu.memory_space<vmem>>, %arg8: memref<1x64xbf16, #tpu.memory_space<vmem>>, %arg9: memref<1x1xf32, #tpu.memory_space<vmem>>, %arg10: memref<8x1xf32, #tpu.memory_space<vmem>>) attributes {dimension_semantics = [#tpu.dimension_semantics<parallel>], iteration_bounds = array<i64: 1>, scalar_prefetch = 0 : i64, scratch_operands = 0 : i64, tpu.core_type = #tpu.core_type<tc>, window_params = [{transform_indices = @transform_0, window_bounds = array<i64: 8, 32>}, {pipeline_mode = #tpu.pipeline_mode<synchronous>, transform_indices = @transform_1, window_bounds = array<i64: 32, 512>}, {pipeline_mode = #tpu.pipeline_mode<synchronous>, transform_indices = @transform_2, window_bounds = array<i64: 1, 512>}, {pipeline_mode = #tpu.pipeline_mode<synchronous>, transform_indices = @transform_3, window_bounds = array<i64: 512, 256>}, {pipeline_mode = #tpu.pipeline_mode<synchronous>, transform_indices = @transform_4, window_bounds = array<i64: 1, 256>}, {pipeline_mode = #tpu.pipeline_mode<synchronous>, transform_indices = @transform_5, window_bounds = array<i64: 256, 64>}, {pipeline_mode = #tpu.pipeline_mode<synchronous>, transform_indices = @transform_6, window_bounds = array<i64: 1, 64>}, {pipeline_mode = #tpu.pipeline_mode<synchronous>, transform_indices = @transform_7, window_bounds = array<i64: 1, 64>}, {pipeline_mode = #tpu.pipeline_mode<synchronous>, transform_indices = @transform_8, window_bounds = array<i64: 1, 1>}, {transform_indices = @transform_9, window_bounds = array<i64: 8, 1>}]} {
    %c0 = arith.constant 0 : index
    %c0_0 = arith.constant 0 : index
    %0 = vector.load %arg1[%c0, %c0_0] : memref<8x32xf32, #tpu.memory_space<vmem>>, vector<8x32xf32>
    %1 = arith.truncf %0 : vector<8x32xf32> to vector<8x32xbf16>
    %c0_1 = arith.constant 0 : index
    %c0_2 = arith.constant 0 : index
    %2 = vector.load %arg2[%c0_1, %c0_2] : memref<32x512xbf16, #tpu.memory_space<vmem>>, vector<32x512xbf16>
    %cst = arith.constant dense<0.000000e+00> : vector<8x512xf32>
    %3 = tpu.matmul %1, %2, %cst {dimension_numbers = #tpu.dot_dimension_numbers<[1], [0], [0], [1], [0, 0, 1, 1], [], []>} : vector<8x32xbf16>, vector<32x512xbf16>, vector<8x512xf32> -> vector<8x512xf32>
    %c0_3 = arith.constant 0 : index
    %c0_4 = arith.constant 0 : index
    %4 = vector.load %arg3[%c0_3, %c0_4] : memref<1x512xf32, #tpu.memory_space<vmem>>, vector<1x512xf32>
    %5 = vector.broadcast %4 : vector<1x512xf32> to vector<8x512xf32>
    %6 = arith.addf %3, %5 : vector<8x512xf32>
    %cst_5 = arith.constant 0.00999999977 : f32
    %7 = vector.broadcast %cst_5 : f32 to vector<8x512xf32>
    %8 = arith.mulf %7, %6 : vector<8x512xf32>
    %9 = arith.maximumf %6, %8 : vector<8x512xf32>
    %10 = arith.truncf %9 : vector<8x512xf32> to vector<8x512xbf16>
    %c0_6 = arith.constant 0 : index
    %c0_7 = arith.constant 0 : index
    %11 = vector.load %arg4[%c0_6, %c0_7] : memref<512x256xbf16, #tpu.memory_space<vmem>>, vector<512x256xbf16>
    %cst_8 = arith.constant dense<0.000000e+00> : vector<8x256xf32>
    %12 = tpu.matmul %10, %11, %cst_8 {dimension_numbers = #tpu.dot_dimension_numbers<[1], [0], [0], [1], [0, 0, 1, 1], [], []>} : vector<8x512xbf16>, vector<512x256xbf16>, vector<8x256xf32> -> vector<8x256xf32>
    %c0_9 = arith.constant 0 : index
    %c0_10 = arith.constant 0 : index
    %13 = vector.load %arg5[%c0_9, %c0_10] : memref<1x256xf32, #tpu.memory_space<vmem>>, vector<1x256xf32>
    %14 = vector.broadcast %13 : vector<1x256xf32> to vector<8x256xf32>
    %15 = arith.addf %12, %14 : vector<8x256xf32>
    %cst_11 = arith.constant 0.00999999977 : f32
    %16 = vector.broadcast %cst_11 : f32 to vector<8x256xf32>
    %17 = arith.mulf %16, %15 : vector<8x256xf32>
    %18 = arith.maximumf %15, %17 : vector<8x256xf32>
    %19 = arith.truncf %18 : vector<8x256xf32> to vector<8x256xbf16>
    %c0_12 = arith.constant 0 : index
    %c0_13 = arith.constant 0 : index
    %20 = vector.load %arg6[%c0_12, %c0_13] : memref<256x64xbf16, #tpu.memory_space<vmem>>, vector<256x64xbf16>
    %cst_14 = arith.constant dense<0.000000e+00> : vector<8x64xf32>
    %21 = tpu.matmul %19, %20, %cst_14 {dimension_numbers = #tpu.dot_dimension_numbers<[1], [0], [0], [1], [0, 0, 1, 1], [], []>} : vector<8x256xbf16>, vector<256x64xbf16>, vector<8x64xf32> -> vector<8x64xf32>
    %c0_15 = arith.constant 0 : index
    %c0_16 = arith.constant 0 : index
    %22 = vector.load %arg7[%c0_15, %c0_16] : memref<1x64xf32, #tpu.memory_space<vmem>>, vector<1x64xf32>
    %23 = vector.broadcast %22 : vector<1x64xf32> to vector<8x64xf32>
    %24 = arith.addf %21, %23 : vector<8x64xf32>
    %cst_17 = arith.constant 0.00999999977 : f32
    %25 = vector.broadcast %cst_17 : f32 to vector<8x64xf32>
    %26 = arith.mulf %25, %24 : vector<8x64xf32>
    %27 = arith.maximumf %24, %26 : vector<8x64xf32>
    %c0_18 = arith.constant 0 : index
    %c0_19 = arith.constant 0 : index
    %28 = vector.load %arg8[%c0_18, %c0_19] : memref<1x64xbf16, #tpu.memory_space<vmem>>, vector<1x64xbf16>
    %29 = arith.extf %28 : vector<1x64xbf16> to vector<1x64xf32>
    %30 = vector.broadcast %29 : vector<1x64xf32> to vector<8x64xf32>
    %31 = arith.mulf %27, %30 : vector<8x64xf32>
    %cst_20 = arith.constant dense<0.000000e+00> : vector<8xf32>
    %32 = vector.multi_reduction <add>, %31, %cst_20 [1] : vector<8x64xf32> to vector<8xf32>
    %33 = vector.shape_cast %32 : vector<8xf32> to vector<8x1xf32>
    %c0_21 = arith.constant 0 : index
    %c0_22 = arith.constant 0 : index
    %34 = vector.load %arg9[%c0_21, %c0_22] : memref<1x1xf32, #tpu.memory_space<vmem>>, vector<1x1xf32>
    %35 = vector.broadcast %34 : vector<1x1xf32> to vector<8x1xf32>
    %36 = arith.addf %33, %35 : vector<8x1xf32>
    %cst_23 = arith.constant 0.00999999977 : f32
    %37 = vector.broadcast %cst_23 : f32 to vector<8x1xf32>
    %38 = arith.mulf %37, %36 : vector<8x1xf32>
    %39 = arith.maximumf %36, %38 : vector<8x1xf32>
    %40 = math.tanh %39 : vector<8x1xf32>
    %c0_24 = arith.constant 0 : index
    %c0_25 = arith.constant 0 : index
    %41 = vector.load %arg10[%c0_24, %c0_25] : memref<8x1xf32, #tpu.memory_space<vmem>>, vector<8x1xf32>
    tpu.vector_store %arg10[%c0_24, %c0_25], %40 {strides = array<i32>} : memref<8x1xf32, #tpu.memory_space<vmem>>, vector<8x1xf32>,
    return
  }
  func.func @transform_0(%arg0: i32) -> (i32, i32) {
    %c0_i32 = arith.constant 0 : i32
    %c0_i32_0 = arith.constant 0 : i32
    return %arg0, %c0_i32 : i32, i32
  }
  func.func @transform_1(%arg0: i32) -> (i32, i32) {
    %c0_i32 = arith.constant 0 : i32
    %c0_i32_0 = arith.constant 0 : i32
    %c0_i32_1 = arith.constant 0 : i32
    return %c0_i32, %c0_i32_0 : i32, i32
  }
  func.func @transform_2(%arg0: i32) -> (i32, i32) {
    %c0_i32 = arith.constant 0 : i32
    %c0_i32_0 = arith.constant 0 : i32
    %c0_i32_1 = arith.constant 0 : i32
    return %c0_i32, %c0_i32_0 : i32, i32
  }
  func.func @transform_3(%arg0: i32) -> (i32, i32) {
    %c0_i32 = arith.constant 0 : i32
    %c0_i32_0 = arith.constant 0 : i32
    %c0_i32_1 = arith.constant 0 : i32
    return %c0_i32, %c0_i32_0 : i32, i32
  }
  func.func @transform_4(%arg0: i32) -> (i32, i32) {
    %c0_i32 = arith.constant 0 : i32
    %c0_i32_0 = arith.constant 0 : i32
    %c0_i32_1 = arith.constant 0 : i32
    return %c0_i32, %c0_i32_0 : i32, i32
  }
  func.func @transform_5(%arg0: i32) -> (i32, i32) {
    %c0_i32 = arith.constant 0 : i32
    %c0_i32_0 = arith.constant 0 : i32
    %c0_i32_1 = arith.constant 0 : i32
    return %c0_i32, %c0_i32_0 : i32, i32
  }
  func.func @transform_6(%arg0: i32) -> (i32, i32) {
    %c0_i32 = arith.constant 0 : i32
    %c0_i32_0 = arith.constant 0 : i32
    %c0_i32_1 = arith.constant 0 : i32
    return %c0_i32, %c0_i32_0 : i32, i32
  }
  func.func @transform_7(%arg0: i32) -> (i32, i32) {
    %c0_i32 = arith.constant 0 : i32
    %c0_i32_0 = arith.constant 0 : i32
    %c0_i32_1 = arith.constant 0 : i32
    return %c0_i32, %c0_i32_0 : i32, i32
  }
  func.func @transform_8(%arg0: i32) -> (i32, i32) {
    %c0_i32 = arith.constant 0 : i32
    %c0_i32_0 = arith.constant 0 : i32
    %c0_i32_1 = arith.constant 0 : i32
    return %c0_i32, %c0_i32_0 : i32, i32
  }
  func.func @transform_9(%arg0: i32) -> (i32, i32) {
    %c0_i32 = arith.constant 0 : i32
    %c0_i32_0 = arith.constant 0 : i32
    return %arg0, %c0_i32 : i32, i32
  }
}

</mosaic_0001>

<bundles_post_ra>
// kernel: mlp_forward.1
= control target key start
LH: loop header
LB: loop body
LE: loop exit
PB: predicated region body
PF: predicated region fallthrough
CT: control target
= control target key end

     0   :  { %vm95_vm0 = vcmask 261120   ;;  %vm827_vm1 = vcmask 523264   ;;  %vm839_vm2 = vcmask 7168   ;;  %s1854_s1 = inlined_call_operand.vmem [shape: bf16[32,512], index: 1, kind: input, shape index: {}]   ;;  %s1855_s0 = inlined_call_operand.vmem [shape: f32[8,32], index: 0, kind: input, shape index: {}]   ;;  %s1856_s3 = inlined_call_operand.vmem [shape: bf16[512,256], index: 3, kind: input, shape index: {}]   ;;  %s1857_s2 = inlined_call_operand.vmem [shape: f32[1,512], index: 2, kind: input, shape index: {}]   ;;  %s1858_s6 = inlined_call_operand.vmem [shape: f32[1,64], index: 6, kind: input, shape index: {}]   ;;  %s1859_s5 = inlined_call_operand.vmem [shape: bf16[256,64], index: 5, kind: input, shape index: {}]   ;;  %s1860_s4 = inlined_call_operand.vmem [shape: f32[1,256], index: 4, kind: input, shape index: {}]   ;;  %s1861_s8 = inlined_call_operand.<no memory space> [shape: f32[1,1], index: 8, kind: input, shape index: {}]   ;;  %s1862_s7 = inlined_call_operand.vmem [shape: bf16[1,64], index: 7, kind: input, shape index: {}]   ;;  %s1863_s9 = inlined_call_operand.vmem [shape: f32[8,1], index: 9, kind: output, shape index: {}]  }
   0x1   :  { %v863_v0 = vld [vmem:[%s1854_s1 + $0x20] sm:$0xf]  ;;  %v1207_v1 = vld [vmem:[%s1854_s1 + $0x2c] sm:$0xf0]  ;;  %v1205_v2 = vld [vmem:[%s1854_s1 + $0x24] sm:$0xf] }
   0x2   :  { %v864_v3 = vor.u32 %v1207_v1, %v863_v0  ;;  %v865_v4 = vld [vmem:[%s1854_s1 + $0x30] sm:$0xf0]  ;;  %v847_v5 = vld [vmem:[%s1854_s1] sm:$0xf]  ;;  %v1203_v6 = vld [vmem:[%s1854_s1 + $0xc] sm:$0xf0] }
   0x3   :  { %v868_v7 = vor.u32 %v1205_v2, %v865_v4  ;;  %v1201_v8 = vld [vmem:[%s1854_s1 + $0x4] sm:$0xf]  ;;  %v849_v9 = vld [vmem:[%s1854_s1 + $0x10] sm:$0xf0]  ;;  %v848_v11 = vor.u32 %v1203_v6, %v847_v5  ;;  %v871_v12 = vld [vmem:[%s1854_s1 + $0x28] sm:$0xf] }
   0x4   :  { %v35_v10 = vld [vmem:[%s1855_s0] sm:$0xff]  ;;  %105 = vmatpush.bf16.msra.mxu2 %v864_v3  ;;  %v1208_v13 = vld [vmem:[%s1854_s1 + $0x34] sm:$0xf0]  ;;  %v1206_v14 = vld [vmem:[%s1854_s1 + $0x2c] sm:$0xf]  ;;  %v852_v15 = vor.u32 %v1201_v8, %v849_v9 }
   0x5   :  { %118 = vmatpush.bf16.msra.mxu3 %v868_v7  ;;  %v872_v16 = vor.u32 %v1208_v13, %v871_v12  ;;  %v873_v17 = vld [vmem:[%s1854_s1 + $0x38] sm:$0xf0]  ;;  %v855_v18 = vld [vmem:[%s1854_s1 + $0x8] sm:$0xf]  ;;  %v1204_v19 = vld [vmem:[%s1854_s1 + $0x14] sm:$0xf0]  ;;  %v1397_v24 = vpack.c.bf16 %v35_v10, %v35_v10 }
   0x6   :  { %v876_v20 = vor.u32 %v1206_v14, %v873_v17  ;;  %v1202_v21 = vld [vmem:[%s1854_s1 + $0xc] sm:$0xf]  ;;  %v857_v22 = vld [vmem:[%s1854_s1 + $0x18] sm:$0xf0]  ;;  %v939_v23 = vld [vmem:[%s1856_s3 + $0x70] sm:$0xf]  ;;  %v856_v33 = vor.u32 %v1204_v19, %v855_v18 }
   0x7   :  { %v1224_v25 = vld [vmem:[%s1856_s3 + $0x74] sm:$0xf0]  ;;  %v1003_v26 = vld [vmem:[%s1856_s3 + $0xf0] sm:$0xf]  ;;  %v931_v30 = vld [vmem:[%s1856_s3 + $0x60] sm:$0xf]  ;;  %v860_v35 = vor.u32 %v1202_v21, %v857_v22 }
   0x8   :  { %v1240_v27 = vld [vmem:[%s1856_s3 + $0xf4] sm:$0xf0]  ;;  %106 = vmatpush.bf16.msra.mxu2 %v848_v11  ;;  %v940_v28 = vor.u32 %v1224_v25, %v939_v23  ;;  %v1222_v31 = vld [vmem:[%s1856_s3 + $0x64] sm:$0xf0]  ;;  %v995_v32 = vld [vmem:[%s1856_s3 + $0xe0] sm:$0xf] }
   0x9   :  { %v1004_v29 = vor.u32 %v1240_v27, %v1003_v26  ;;  %119 = vmatpush.bf16.msra.mxu3 %v852_v15  ;;  %v1238_v34 = vld [vmem:[%s1856_s3 + $0xe4] sm:$0xf0]  ;;  %v932_v36 = vor.u32 %v1222_v31, %v931_v30  ;;  %v923_v38 = vld [vmem:[%s1856_s3 + $0x50] sm:$0xf]  ;;  %v1220_v39 = vld [vmem:[%s1856_s3 + $0x54] sm:$0xf0] }
   0xa   :  { %553 = vmatpush.bf16.msra.mxu0 %v940_v28  ;;  %v996_v37 = vor.u32 %v1238_v34, %v995_v32  ;;  %v987_v40 = vld [vmem:[%s1856_s3 + $0xd0] sm:$0xf]  ;;  %v1236_v41 = vld [vmem:[%s1856_s3 + $0xd4] sm:$0xf0]  ;;  %v924_v44 = vor.u32 %v1220_v39, %v923_v38  ;;  %v915_v45 = vld [vmem:[%s1856_s3 + $0x40] sm:$0xf] }
   0xb   :  { %877 = vmatmul.msk.bf16.vlgmr.msra.gmra.mxu2 %vm95_vm0, %v1397_v24  ;;  %566 = vmatpush.bf16.msra.mxu1 %v1004_v29  ;;  %v1067_v42 = vld [vmem:[%s1856_s3 + $0x170] sm:$0xf]  ;;  %v1256_v43 = vld [vmem:[%s1856_s3 + $0x174] sm:$0xf0]  ;;  %v988_v49 = vor.u32 %v1236_v41, %v987_v40  ;;  %v1218_v50 = vld [vmem:[%s1856_s3 + $0x44] sm:$0xf0] }
   0xc   :  { %131 = vmatpush.bf16.msrb.mxu2 %v872_v16  ;;  %878 = vmatmul.msk.bf16.vlgmr.msra.gmra.mxu3 %vm95_vm0, %v1397_v24  ;;  %v1068_v46 = vor.u32 %v1256_v43, %v1067_v42  ;;  %v1131_v47 = vld [vmem:[%s1856_s3 + $0x1f0] sm:$0xf]  ;;  %v1272_v48 = vld [vmem:[%s1856_s3 + $0x1f4] sm:$0xf0]  ;;  %v979_v51 = vld [vmem:[%s1856_s3 + $0xc0] sm:$0xf]  ;;  %v916_v59 = vor.u32 %v1218_v50, %v915_v45 }
   0xd   :  { %144 = vmatpush.bf16.msrb.mxu3 %v876_v20  ;;  %v1234_v52 = vld [vmem:[%s1856_s3 + $0xc4] sm:$0xf0]  ;;  %v1132_v53 = vor.u32 %v1272_v48, %v1131_v47  ;;  %v1059_v54 = vld [vmem:[%s1856_s3 + $0x160] sm:$0xf]  ;;  %v907_v60 = vld [vmem:[%s1856_s3 + $0x30] sm:$0xf] }
   0xe   :  { %554 = vmatpush.bf16.msra.mxu0 %v932_v36  ;;  %v1254_v55 = vld [vmem:[%s1856_s3 + $0x164] sm:$0xf0]  ;;  %v1123_v56 = vld [vmem:[%s1856_s3 + $0x1e0] sm:$0xf]  ;;  %v1216_v61 = vld [vmem:[%s1856_s3 + $0x34] sm:$0xf0]  ;;  %v980_v0 = vor.u32 %v1234_v52, %v979_v51 }
   0xf   :  { %567 = vmatpush.bf16.msra.mxu1 %v996_v37  ;;  %v1060_v57 = vor.u32 %v1254_v55, %v1059_v54  ;;  %v1270_v58 = vld [vmem:[%s1856_s3 + $0x1e4] sm:$0xf0]  ;;  %v1051_v63 = vld [vmem:[%s1856_s3 + $0x150] sm:$0xf]  ;;  %v1252_v1 = vld [vmem:[%s1856_s3 + $0x154] sm:$0xf0]  ;;  %v908_v10 = vor.u32 %v1216_v61, %v907_v60 }
  0x10   :  { %132 = vmatpush.bf16.msrb.mxu2 %v856_v33  ;;  %v1124_v62 = vor.u32 %v1270_v58, %v1123_v56  ;;  %v1115_v2 = vld [vmem:[%s1856_s3 + $0x1d0] sm:$0xf]  ;;  %v1268_v3 = vld [vmem:[%s1856_s3 + $0x1d4] sm:$0xf0]  ;;  %v1052_v6 = vor.u32 %v1252_v1, %v1051_v63  ;;  %v1043_v8 = vld [vmem:[%s1856_s3 + $0x140] sm:$0xf] }
  0x11   :  { %145 = vmatpush.bf16.msrb.mxu3 %v860_v35  ;;  %v971_v4 = vld [vmem:[%s1856_s3 + $0xb0] sm:$0xf]  ;;  %v1232_v5 = vld [vmem:[%s1856_s3 + $0xb4] sm:$0xf0]  ;;  %v1116_v7 = vor.u32 %v1268_v3, %v1115_v2  ;;  %v1250_v9 = vld [vmem:[%s1856_s3 + $0x144] sm:$0xf0] }
  0x12   :  { %555 = vmatpush.bf16.msra.mxu0 %v924_v44  ;;  %v1107_v11 = vld [vmem:[%s1856_s3 + $0x1c0] sm:$0xf]  ;;  %v1266_v12 = vld [vmem:[%s1856_s3 + $0x1c4] sm:$0xf0]  ;;  %v972_v13 = vor.u32 %v1232_v5, %v971_v4  ;;  %v1044_v18 = vor.u32 %v1250_v9, %v1043_v8  ;;  %v1035_v20 = vld [vmem:[%s1856_s3 + $0x130] sm:$0xf] }
  0x13   :  { %568 = vmatpush.bf16.msra.mxu1 %v988_v49  ;;  %v899_v14 = vld [vmem:[%s1856_s3 + $0x20] sm:$0xf]  ;;  %v1214_v15 = vld [vmem:[%s1856_s3 + $0x24] sm:$0xf0]  ;;  %v1108_v19 = vor.u32 %v1266_v12, %v1107_v11  ;;  %v1248_v21 = vld [vmem:[%s1856_s3 + $0x134] sm:$0xf0] }
  0x14   :  { %579 = vmatpush.bf16.msra.mxu2 %v1068_v46  ;;  %v963_v16 = vld [vmem:[%s1856_s3 + $0xa0] sm:$0xf]  ;;  %v1230_v17 = vld [vmem:[%s1856_s3 + $0xa4] sm:$0xf0]  ;;  %v900_v22 = vor.u32 %v1214_v15, %v899_v14  ;;  %v1099_v23 = vld [vmem:[%s1856_s3 + $0x1b0] sm:$0xf]  ;;  %v1036_v31 = vor.u32 %v1248_v21, %v1035_v20 }
  0x15   :  { %592 = vmatpush.bf16.msra.mxu3 %v1132_v53  ;;  %v1264_v25 = vld [vmem:[%s1856_s3 + $0x1b4] sm:$0xf0]  ;;  %v964_v26 = vor.u32 %v1230_v17, %v963_v16  ;;  %v891_v27 = vld [vmem:[%s1856_s3 + $0x10] sm:$0xf]  ;;  %v1210_v35 = vld [vmem:[%s1856_s3 + $0x4] sm:$0xf0] }
  0x16   :  { %556 = vmatpush.bf16.msra.mxu0 %v916_v59  ;;  %v1212_v28 = vld [vmem:[%s1856_s3 + $0x14] sm:$0xf0]  ;;  %v955_v29 = vld [vmem:[%s1856_s3 + $0x90] sm:$0xf]  ;;  %v1100_v32 = vor.u32 %v1264_v25, %v1099_v23  ;;  %v947_v36 = vld [vmem:[%s1856_s3 + $0x80] sm:$0xf] }
  0x17   :  { %569 = vmatpush.bf16.msra.mxu1 %v980_v0  ;;  %v1228_v30 = vld [vmem:[%s1856_s3 + $0x94] sm:$0xf0]  ;;  %v892_v33 = vor.u32 %v1212_v28, %v891_v27  ;;  %v1226_v37 = vld [vmem:[%s1856_s3 + $0x84] sm:$0xf0]  ;;  %v1223_v38 = vld [vmem:[%s1856_s3 + $0x74] sm:$0xf] }
  0x18   :  { %580 = vmatpush.bf16.msra.mxu2 %v1060_v57  ;;  %v956_v34 = vor.u32 %v1228_v30, %v955_v29  ;;  %v941_v39 = vld [vmem:[%s1856_s3 + $0x78] sm:$0xf0]  ;;  %v1239_v40 = vld [vmem:[%s1856_s3 + $0xf4] sm:$0xf]  ;;  %v948_v43 = vor.u32 %v1226_v37, %v947_v36  ;;  %v1221_v46 = vld [vmem:[%s1856_s3 + $0x64] sm:$0xf] }
  0x19   :  { %593 = vmatpush.bf16.msra.mxu3 %v1124_v62  ;;  %v1005_v41 = vld [vmem:[%s1856_s3 + $0xf8] sm:$0xf0]  ;;  %v944_v44 = vor.u32 %v1223_v38, %v941_v39  ;;  %v933_v47 = vld [vmem:[%s1856_s3 + $0x68] sm:$0xf0]  ;;  %v1237_v48 = vld [vmem:[%s1856_s3 + $0xe4] sm:$0xf] }
  0x1a   :  { %557 = vmatpush.bf16.msra.mxu0 %v908_v10  ;;  %v1008_v45 = vor.u32 %v1239_v40, %v1005_v41  ;;  %v997_v49 = vld [vmem:[%s1856_s3 + $0xe8] sm:$0xf0]  ;;  %v936_v50 = vor.u32 %v1221_v46, %v933_v47  ;;  %v1027_v52 = vld [vmem:[%s1856_s3 + $0x120] sm:$0xf]  ;;  %v1246_v53 = vld [vmem:[%s1856_s3 + $0x124] sm:$0xf0] }
  0x1b   :  { %879 = vmatmul.msk.bf16.vlgmr.msrb.gmra.mxu2 %vm95_vm0, %v1397_v24  ;;  %570 = vmatpush.bf16.msra.mxu1 %v972_v13  ;;  %v1000_v51 = vor.u32 %v1237_v48, %v997_v49  ;;  %v1091_v54 = vld [vmem:[%s1856_s3 + $0x1a0] sm:$0xf]  ;;  %v1028_v55 = vor.u32 %v1246_v53, %v1027_v52  ;;  %v1262_v56 = vld [vmem:[%s1856_s3 + $0x1a4] sm:$0xf0]  ;;  %v1219_v57 = vld [vmem:[%s1856_s3 + $0x54] sm:$0xf] }
  0x1c   :  { %581 = vmatpush.bf16.msra.mxu2 %v1052_v6  ;;  %880 = vmatmul.msk.bf16.vlgmr.msrb.gmra.mxu3 %vm95_vm0, %v1397_v24  ;;  %v883_v24 = vld [vmem:[%s1856_s3] sm:$0xf]  ;;  %v1092_v58 = vor.u32 %v1262_v56, %v1091_v54  ;;  %v925_v59 = vld [vmem:[%s1856_s3 + $0x58] sm:$0xf0]  ;;  %v1235_v60 = vld [vmem:[%s1856_s3 + $0xd4] sm:$0xf] }
  0x1d   :  { %594 = vmatpush.bf16.msra.mxu3 %v1116_v7  ;;  %v884_v42 = vor.u32 %v1210_v35, %v883_v24  ;;  %v989_v61 = vld [vmem:[%s1856_s3 + $0xd8] sm:$0xf0]  ;;  %v928_v62 = vor.u32 %v1219_v57, %v925_v59  ;;  %v1019_v0 = vld [vmem:[%s1856_s3 + $0x110] sm:$0xf]  ;;  %v1244_v1 = vld [vmem:[%s1856_s3 + $0x114] sm:$0xf0] }
  0x1e   :  { %558 = vmatpush.bf16.msra.mxu0 %v900_v22  ;;  %v992_v63 = vor.u32 %v1235_v60, %v989_v61  ;;  %v1083_v2 = vld [vmem:[%s1856_s3 + $0x190] sm:$0xf]  ;;  %v1020_v3 = vor.u32 %v1244_v1, %v1019_v0  ;;  %v1260_v4 = vld [vmem:[%s1856_s3 + $0x194] sm:$0xf0]  ;;  %v1217_v5 = vld [vmem:[%s1856_s3 + $0x44] sm:$0xf] }
  0x1f   :  { %571 = vmatpush.bf16.msra.mxu1 %v964_v26  ;;  %v917_v6 = vld [vmem:[%s1856_s3 + $0x48] sm:$0xf0]  ;;  %v1084_v7 = vor.u32 %v1260_v4, %v1083_v2  ;;  %v1233_v9 = vld [vmem:[%s1856_s3 + $0xc4] sm:$0xf]  ;;  %v1011_v12 = vld [vmem:[%s1856_s3 + $0x100] sm:$0xf] }
  0x20   :  { %582 = vmatpush.bf16.msra.mxu2 %v1044_v18  ;;  %v920_v8 = vor.u32 %v1217_v5, %v917_v6  ;;  %v981_v10 = vld [vmem:[%s1856_s3 + $0xc8] sm:$0xf0]  ;;  %v1242_v13 = vld [vmem:[%s1856_s3 + $0x104] sm:$0xf0]  ;;  %v1075_v14 = vld [vmem:[%s1856_s3 + $0x180] sm:$0xf] }
  0x21   :  { %595 = vmatpush.bf16.msra.mxu3 %v1108_v19  ;;  %v984_v11 = vor.u32 %v1233_v9, %v981_v10  ;;  %v1012_v15 = vor.u32 %v1242_v13, %v1011_v12  ;;  %v1258_v16 = vld [vmem:[%s1856_s3 + $0x184] sm:$0xf0]  ;;  %v1215_v17 = vld [vmem:[%s1856_s3 + $0x34] sm:$0xf]  ;;  %v909_v18 = vld [vmem:[%s1856_s3 + $0x38] sm:$0xf0] }
  0x22   :  { %559 = vmatpush.bf16.msra.mxu0 %v892_v33  ;;  %v1076_v19 = vor.u32 %v1258_v16, %v1075_v14  ;;  %v912_v20 = vor.u32 %v1215_v17, %v909_v18  ;;  %v1231_v21 = vld [vmem:[%s1856_s3 + $0xb4] sm:$0xf]  ;;  %v973_v22 = vld [vmem:[%s1856_s3 + $0xb8] sm:$0xf0]  ;;  %v1229_v33 = vld [vmem:[%s1856_s3 + $0xa4] sm:$0xf] }
  0x23   :  { %572 = vmatpush.bf16.msra.mxu1 %v956_v34  ;;  %v1255_v23 = vld [vmem:[%s1856_s3 + $0x174] sm:$0xf]  ;;  %v976_v25 = vor.u32 %v1231_v21, %v973_v22  ;;  %v1069_v26 = vld [vmem:[%s1856_s3 + $0x178] sm:$0xf0]  ;;  %v965_v24 = vld [vmem:[%s1856_s3 + $0xa8] sm:$0xf0] }
  0x24   :  { %583 = vmatpush.bf16.msra.mxu2 %v1036_v31  ;;  %v1271_v27 = vld [vmem:[%s1856_s3 + $0x1f4] sm:$0xf]  ;;  %v1133_v28 = vld [vmem:[%s1856_s3 + $0x1f8] sm:$0xf0]  ;;  %v1072_v29 = vor.u32 %v1255_v23, %v1069_v26  ;;  %v1213_v31 = vld [vmem:[%s1856_s3 + $0x24] sm:$0xf]  ;;  %v968_v37 = vor.u32 %v1229_v33, %v965_v24 }
  0x25   :  { %596 = vmatpush.bf16.msra.mxu3 %v1100_v32  ;;  %v1136_v30 = vor.u32 %v1271_v27, %v1133_v28  ;;  %v901_v32 = vld [vmem:[%s1856_s3 + $0x28] sm:$0xf0]  ;;  %v1253_v35 = vld [vmem:[%s1856_s3 + $0x164] sm:$0xf]  ;;  %v957_v46 = vld [vmem:[%s1856_s3 + $0x98] sm:$0xf0] }
  0x26   :  { %560 = vmatpush.bf16.msra.mxu0 %v884_v42  ;;  %v904_v34 = vor.u32 %v1213_v31, %v901_v32  ;;  %v1061_v36 = vld [vmem:[%s1856_s3 + $0x168] sm:$0xf0]  ;;  %v1269_v39 = vld [vmem:[%s1856_s3 + $0x1e4] sm:$0xf]  ;;  %v1211_v42 = vld [vmem:[%s1856_s3 + $0x14] sm:$0xf] }
  0x27   :  { %573 = vmatpush.bf16.msra.mxu1 %v948_v43  ;;  %v1064_v38 = vor.u32 %v1253_v35, %v1061_v36  ;;  %v1125_v40 = vld [vmem:[%s1856_s3 + $0x1e8] sm:$0xf0]  ;;  %v893_v43 = vld [vmem:[%s1856_s3 + $0x18] sm:$0xf0]  ;;  %v1251_v47 = vld [vmem:[%s1856_s3 + $0x154] sm:$0xf] }
  0x28   :  { %584 = vmatpush.bf16.msra.mxu2 %v1028_v55  ;;  %v1128_v41 = vor.u32 %v1269_v39, %v1125_v40  ;;  %v1053_v49 = vld [vmem:[%s1856_s3 + $0x158] sm:$0xf0]  ;;  %v1209_v54 = vld [vmem:[%s1856_s3 + $0x4] sm:$0xf]  ;;  %v885_v55 = vld [vmem:[%s1856_s3 + $0x8] sm:$0xf0] }
  0x29   :  { %597 = vmatpush.bf16.msra.mxu3 %v1092_v58  ;;  %v1056_v52 = vor.u32 %v1251_v47, %v1053_v49  ;;  %v1225_v56 = vld [vmem:[%s1856_s3 + $0x84] sm:$0xf]  ;;  %v888_v57 = vor.u32 %v1209_v54, %v885_v55  ;;  %v949_v58 = vld [vmem:[%s1856_s3 + $0x88] sm:$0xf0]  ;;  %v1247_v2 = vld [vmem:[%s1856_s3 + $0x134] sm:$0xf] }
  0x2a   :  { %605 = vmatpush.bf16.msrb.mxu0 %v944_v44  ;;  %v896_v44 = vor.u32 %v1211_v42, %v893_v43  ;;  %v1249_v59 = vld [vmem:[%s1856_s3 + $0x144] sm:$0xf]  ;;  %v1045_v60 = vld [vmem:[%s1856_s3 + $0x148] sm:$0xf0]  ;;  %v952_v61 = vor.u32 %v1225_v56, %v949_v58  ;;  %v1263_v4 = vld [vmem:[%s1856_s3 + $0x1b4] sm:$0xf] }
  0x2b   :  { %618 = vmatpush.bf16.msrb.mxu1 %v1008_v45  ;;  %v1227_v45 = vld [vmem:[%s1856_s3 + $0x94] sm:$0xf]  ;;  %v1109_v0 = vld [vmem:[%s1856_s3 + $0x1c8] sm:$0xf0]  ;;  %v45_v5 = vld [vmem:[%s1857_s2] sm:$0xf] }
  0x2c   :  { %585 = vmatpush.bf16.msra.mxu2 %v1020_v3  ;;  %v960_v48 = vor.u32 %v1227_v45, %v957_v46  ;;  %v1037_v3 = vld [vmem:[%s1856_s3 + $0x138] sm:$0xf0]  ;;  %v1245_v9 = vld [vmem:[%s1856_s3 + $0x124] sm:$0xf]  ;;  %v1029_v10 = vld [vmem:[%s1856_s3 + $0x128] sm:$0xf0] }
  0x2d   :  { %598 = vmatpush.bf16.msra.mxu3 %v1084_v7  ;;  %v1040_v6 = vor.u32 %v1247_v2, %v1037_v3  ;;  %v1101_v7 = vld [vmem:[%s1856_s3 + $0x1b8] sm:$0xf0]  ;;  %v1093_v12 = vld [vmem:[%s1856_s3 + $0x1a8] sm:$0xf0]  ;;  %v47_v13 = vperm.slane %v45_v5, 0  ;;  %v48_v14 = vperm.slane %v45_v5, 1 }
  0x2e   :  { %606 = vmatpush.bf16.msrb.mxu0 %v936_v50  ;;  %v1267_v50 = vld [vmem:[%s1856_s3 + $0x1d4] sm:$0xf]  ;;  %v1021_v18 = vld [vmem:[%s1856_s3 + $0x118] sm:$0xf0]  ;;  %v1241_v28 = vld [vmem:[%s1856_s3 + $0x104] sm:$0xf] }
  0x2f   :  { %619 = vmatpush.bf16.msrb.mxu1 %v1000_v51  ;;  %v1117_v51 = vld [vmem:[%s1856_s3 + $0x1d8] sm:$0xf0]  ;;  %v1243_v17 = vld [vmem:[%s1856_s3 + $0x114] sm:$0xf]  ;;  %v1257_v31 = vld [vmem:[%s1856_s3 + $0x184] sm:$0xf] }
  0x30   :  { %586 = vmatpush.bf16.msra.mxu2 %v1012_v15  ;;  %v1120_v53 = vor.u32 %v1267_v50, %v1117_v51  ;;  %v1032_v15 = vor.u32 %v1245_v9, %v1029_v10  ;;  %v1077_v32 = vld [vmem:[%s1856_s3 + $0x188] sm:$0xf0]  ;;  %v50_v42 = vperm.slane %v45_v5, 3  ;;  %v1280_v55 = vld [vmem:[%s1859_s5 + $0x38] sm:$0xff]  ;;  %v1279_v56 = vld [vmem:[%s1859_s5 + $0x30] sm:$0xff] }
  0x31   :  { %599 = vmatpush.bf16.msra.mxu3 %v1076_v19  ;;  %v1259_v19 = vld [vmem:[%s1856_s3 + $0x194] sm:$0xf]  ;;  %v1080_v36 = vor.u32 %v1257_v31, %v1077_v32  ;;  %v1277_v58 = vld [vmem:[%s1859_s5 + $0x20] sm:$0xff]  ;;  %v1282_v9 = vld [vmem:[%s1859_s5 + $0x48] sm:$0xff] }
  0x32   :  { %607 = vmatpush.bf16.msrb.mxu0 %v928_v62  ;;  %v1048_v62 = vor.u32 %v1249_v59, %v1045_v60  ;;  %v1276_v59 = vld [vmem:[%s1859_s5 + $0x18] sm:$0xff]  ;;  %v1285_v2 = vld [vmem:[%s1859_s5 + $0x60] sm:$0xff] }
  0x33   :  { %620 = vmatpush.bf16.msrb.mxu1 %v992_v63  ;;  %v1265_v63 = vld [vmem:[%s1856_s3 + $0x1c4] sm:$0xf]  ;;  %v1288_v60 = vld [vmem:[%s1859_s5 + $0x78] sm:$0xff]  ;;  %v227_v10 = vld [vmem:[%s1860_s4] sm:$0x3] }
  0x34   :  { %631 = vmatpush.bf16.msrb.mxu2 %v1072_v29  ;;  %v1112_v1 = vor.u32 %v1265_v63, %v1109_v0  ;;  %v1013_v29 = vld [vmem:[%s1856_s3 + $0x108] sm:$0xf0] }
  0x35   :  { %644 = vmatpush.bf16.msrb.mxu3 %v1136_v30  ;;  %v1016_v24 = vor.u32 %v1241_v28, %v1013_v29  ;;  %v1274_v63 = vld [vmem:[%s1859_s5 + $0x8] sm:$0xff] }
  0x36   :  { %608 = vmatpush.bf16.msrb.mxu0 %v920_v8  ;;  %v1104_v8 = vor.u32 %v1263_v4, %v1101_v7  ;;  %v1286_v0 = vld [vmem:[%s1859_s5 + $0x68] sm:$0xff] }
  0x37   :  { %621 = vmatpush.bf16.msrb.mxu1 %v984_v11  ;;  %v1261_v11 = vld [vmem:[%s1856_s3 + $0x1a4] sm:$0xf] }
  0x38   :  { %632 = vmatpush.bf16.msrb.mxu2 %v1064_v38  ;;  %v1096_v16 = vor.u32 %v1261_v11, %v1093_v12  ;;  %v229_v11 = vperm.slane %v227_v10, 0  ;;  %v1281_v12 = vld [vmem:[%s1859_s5 + $0x40] sm:$0xff] }
  0x39   :  { %645 = vmatpush.bf16.msrb.mxu3 %v1128_v41  ;;  %v49_v41 = vperm.slane %v45_v5, 2  ;;  %v1284_v5 = vld [vmem:[%s1859_s5 + $0x58] sm:$0xff] }
  0x3a   :  { %609 = vmatpush.bf16.msrb.mxu0 %v912_v20  ;;  %v1085_v20 = vld [vmem:[%s1856_s3 + $0x198] sm:$0xf0] }
  0x3b   :  { %622 = vmatpush.bf16.msrb.mxu1 %v976_v25  ;;  %v1024_v25 = vor.u32 %v1243_v17, %v1021_v18  ;;  %v1088_v26 = vor.u32 %v1259_v19, %v1085_v20 }
  0x3c   :  { %633 = vmatpush.bf16.msrb.mxu2 %v1056_v52 }
  0x3d   :  { %646 = vmatpush.bf16.msrb.mxu3 %v1120_v53 }
  0x3e   :  { %610 = vmatpush.bf16.msrb.mxu0 %v904_v34 }
  0x3f   :  { %623 = vmatpush.bf16.msrb.mxu1 %v968_v37 }
  0x40   :  { %634 = vmatpush.bf16.msrb.mxu2 %v1048_v62  ;;  %v1287_v62 = vld [vmem:[%s1859_s5 + $0x70] sm:$0xff] }
  0x41   :  { %647 = vmatpush.bf16.msrb.mxu3 %v1112_v1  ;;  %v1273_v1 = vld [vmem:[%s1859_s5] sm:$0xff] }
  0x42   :  { %611 = vmatpush.bf16.msrb.mxu0 %v896_v44 }
  0x43   :  { %624 = vmatpush.bf16.msrb.mxu1 %v960_v48 }
  0x44   :  { %635 = vmatpush.bf16.msrb.mxu2 %v1040_v6  ;;  %v1283_v6 = vld [vmem:[%s1859_s5 + $0x50] sm:$0xff] }
  0x45   :  { %648 = vmatpush.bf16.msrb.mxu3 %v1104_v8 }
  0x46   :  { %612 = vmatpush.bf16.msrb.mxu0 %v888_v57  ;;  %v1278_v57 = vld [vmem:[%s1859_s5 + $0x28] sm:$0xff] }
  0x47   :  { %625 = vmatpush.bf16.msrb.mxu1 %v952_v61  ;;  %v1275_v61 = vld [vmem:[%s1859_s5 + $0x10] sm:$0xff] }
  0x48   :  { %636 = vmatpush.bf16.msrb.mxu2 %v1032_v15 }
  0x49   :  { %649 = vmatpush.bf16.msrb.mxu3 %v1096_v16 }
  0x4c   :  { %637 = vmatpush.bf16.msrb.mxu2 %v1024_v25  ;;  %v230_v25 = vperm.slane %v227_v10, 1 }
  0x4d   :  { %650 = vmatpush.bf16.msrb.mxu3 %v1088_v26 }
  0x50   :  { %638 = vmatpush.bf16.msrb.mxu2 %v1016_v24 }
  0x51   :  { %651 = vmatpush.bf16.msrb.mxu3 %v1080_v36 }
  0x8e   :  { %v108_v21 = vpop.f32.mrf.mxu2 }
  0x8f   :  { %v109_v22 = vadd.f32 %v108_v21, %v47_v13  ;;  %v121_v23 = vpop.f32.mrf.mxu3 }
  0x90   :  { %v122_v27 = vadd.f32 %v121_v23, %v48_v14 }
  0x91   :  { %v151_v30 = vmul.f32 0.01, %v109_v22 }
  0x92   :  { %v152_v33 = vmul.f32 0.01, %v122_v27 }
  0x93   :  { %v155_v34 = vmax.f32 %v109_v22, %v151_v30 }
  0x94   :  { %v156_v35 = vmax.f32 %v122_v27, %v152_v33 }
  0x95   :  { %v159_v37 = vpack.c.bf16 %v155_v34, %v155_v34 }
  0x96   :  { %v110_v38 = vpop.f32.mrf.mxu2  ;;  %v160_v39 = vpack.c.bf16 %v156_v35, %v156_v35 }
  0x97   :  { %v123_v40 = vpop.f32.mrf.mxu3  ;;  %561 = vmatmul.bf16.vlgmr.msra.gmra.mxu0 %v159_v37 }
  0x98   :  { %574 = vmatmul.bf16.vlgmr.msra.gmra.mxu1 %v160_v39  ;;  %795 = vmatpush.bf16.msra.mxu0 %v1280_v55  ;;  %v14_v40 = vstv %s1861_s8 }
  0x99   :  { %808 = vmatpush.bf16.msra.mxu1 %v1288_v60  ;;  %15 = vst [vmem:[#allocation2] sm:$0x1] %v14_v40 }
  0x9c   :  { %796 = vmatpush.bf16.msra.mxu0 %v1279_v56 }
  0x9d   :  { %809 = vmatpush.bf16.msra.mxu1 %v1287_v62 }
  0x9e   :  { %v134_v43 = vpop.f32.mrf.mxu2 }
  0x9f   :  { %v135_v44 = vadd.f32 %v134_v43, %v49_v41  ;;  %v147_v45 = vpop.f32.mrf.mxu3  ;;  %v1289_v43 = vld [vmem:[%s1858_s6] ss:$0 sm:$0xff] }
  0xa0   :  { %v148_v46 = vadd.f32 %v147_v45, %v50_v42  ;;  %797 = vmatpush.bf16.msra.mxu0 %v1278_v57  ;;  %v1290_v55 = vld [vmem:[#allocation2] ss:$0 sm:$0xff] }
  0xa1   :  { %v153_v47 = vmul.f32 0.01, %v135_v44  ;;  %810 = vmatpush.bf16.msra.mxu1 %v1286_v0 }
  0xa2   :  { %v154_v48 = vmul.f32 0.01, %v148_v46 }
  0xa3   :  { %v157_v49 = vmax.f32 %v135_v44, %v153_v47  ;;  %v823_v44 = vld [vmem:[%s1862_s7] sm:$0x1] }
  0xa4   :  { %v158_v50 = vmax.f32 %v148_v46, %v154_v48  ;;  %798 = vmatpush.bf16.msra.mxu0 %v1277_v58  ;;  %v824_v46 = vunpack.c.l.bf16 %v823_v44 }
  0xa5   :  { %v161_v51 = vpack.c.bf16 %v157_v49, %v157_v49  ;;  %811 = vmatpush.bf16.msra.mxu1 %v1285_v2 }
  0xa6   :  { %v162_v52 = vpack.c.bf16 %v158_v50, %v158_v50  ;;  %v136_v53 = vpop.f32.mrf.mxu2  ;;  %v825_v50 = vperm.slane %v824_v46, 0 }
  0xa7   :  { %v149_v54 = vpop.f32.mrf.mxu3  ;;  %587 = vmatmul.bf16.vlgmr.msra.gmra.mxu2 %v161_v51  ;;  %613 = vmatmul.bf16.vlgmr.msrb.gmra.mxu0 %v159_v37 }
  0xa8   :  { %600 = vmatmul.bf16.vlgmr.msra.gmra.mxu3 %v162_v52  ;;  %626 = vmatmul.bf16.vlgmr.msrb.gmra.mxu1 %v160_v39 }
  0xa9   :  { %799 = vmatpush.bf16.msra.mxu0 %v1276_v59  ;;  %812 = vmatpush.bf16.msra.mxu1 %v1284_v5 }
  0xad   :  { %800 = vmatpush.bf16.msra.mxu0 %v1275_v61  ;;  %813 = vmatpush.bf16.msra.mxu1 %v1283_v6 }
  0xb1   :  { %801 = vmatpush.bf16.msra.mxu0 %v1274_v63  ;;  %814 = vmatpush.bf16.msra.mxu1 %v1282_v9 }
  0xb5   :  { %802 = vmatpush.bf16.msra.mxu0 %v1273_v1  ;;  %815 = vmatpush.bf16.msra.mxu1 %v1281_v12 }
  0xb7   :  { %639 = vmatmul.bf16.vlgmr.msrb.gmra.mxu2 %v161_v51 }
  0xb8   :  { %652 = vmatmul.bf16.vlgmr.msrb.gmra.mxu3 %v162_v52 }
 0x114   :  { %v562_v3 = vpop.f32.mrf.mxu0 }
 0x115   :  { %v575_v4 = vpop.f32.mrf.mxu1  ;;  %v563_v14 = vadd.f32 %v562_v3, %v229_v11 }
 0x117   :  { %v576_v16 = vadd.f32 %v575_v4, %v563_v14 }
 0x11c   :  { %v564_v7 = vpop.f32.mrf.mxu0 }
 0x11d   :  { %v577_v8 = vpop.f32.mrf.mxu1 }
 0x124   :  { %v614_v13 = vpop.f32.mrf.mxu0 }
 0x125   :  { %v627_v15 = vpop.f32.mrf.mxu1  ;;  %v615_v30 = vadd.f32 %v614_v13, %v230_v25 }
 0x127   :  { %v628_v31 = vadd.f32 %v627_v15, %v615_v30 }
 0x12a   :  { %v588_v17 = vpop.f32.mrf.mxu2 }
 0x12b   :  { %v589_v18 = vadd.f32 %v588_v17, %v576_v16  ;;  %v601_v19 = vpop.f32.mrf.mxu3 }
 0x12c   :  { %v616_v20 = vpop.f32.mrf.mxu0 }
 0x12d   :  { %v602_v21 = vadd.f32 %v601_v19, %v589_v18  ;;  %v629_v22 = vpop.f32.mrf.mxu1 }
 0x12f   :  { %v657_v23 = vmul.f32 0.01, %v602_v21 }
 0x131   :  { %v659_v26 = vmax.f32 %v602_v21, %v657_v23 }
 0x132   :  { %v590_v27 = vpop.f32.mrf.mxu2 }
 0x133   :  { %v661_v28 = vpack.c.bf16 %v659_v26, %v659_v26  ;;  %v603_v29 = vpop.f32.mrf.mxu3 }
 0x135   :  { %803 = vmatmul.bf16.vlgmr.msra.gmra.mxu0 %v661_v28 }
 0x13a   :  { %v640_v32 = vpop.f32.mrf.mxu2 }
 0x13b   :  { %v641_v33 = vadd.f32 %v640_v32, %v628_v31  ;;  %v653_v34 = vpop.f32.mrf.mxu3 }
 0x13d   :  { %v654_v24 = vadd.f32 %v653_v34, %v641_v33 }
 0x13f   :  { %v658_v35 = vmul.f32 0.01, %v654_v24 }
 0x141   :  { %v660_v36 = vmax.f32 %v654_v24, %v658_v35 }
 0x142   :  { %v642_v37 = vpop.f32.mrf.mxu2 }
 0x143   :  { %v662_v38 = vpack.c.bf16 %v660_v36, %v660_v36  ;;  %v655_v39 = vpop.f32.mrf.mxu3 }
 0x145   :  { %816 = vmatmul.bf16.vlgmr.msra.gmra.mxu1 %v662_v38 }
 0x1b2   :  { %v804_v41 = vpop.f32.mrf.mxu0 }
 0x1b3   :  { %v805_v45 = vadd.f32 %v1289_v43, %v804_v41 }
 0x1ba   :  { %v806_v42 = vpop.f32.mrf.mxu0 }
 0x1c2   :  { %v817_v47 = vpop.f32.mrf.mxu1 }
 0x1c3   :  { %v818_v48 = vadd.f32 %v817_v47, %v805_v45 }
 0x1c5   :  { %v821_v49 = vmul.f32 0.01, %v818_v48 }
 0x1c7   :  { %v822_v51 = vmax.f32 %v818_v48, %v821_v49 }
 0x1c9   :  { %v826_v52 = vmul.f32 %v825_v50, %v822_v51 }
 0x1ca   :  { %v819_v53 = vpop.f32.mrf.mxu1 }
 0x1cb   :  { %v828_v54 = vsel %vm827_vm1, %v826_v52, 0.0 }
 0x1cc   :  { %829 = vadd.xlane.f32.xlu0 %v828_v54 }
 0x23f   :  { %v830_v56 = vpop.xlane.xlu0 %829 }
 0x240   :  { %v835_v57 = vadd.f32 %v1290_v55, %v830_v56 }
 0x242   :  { %v836_v58 = vmul.f32 0.01, %v835_v57 }
 0x244   :  { %v837_v59 = vmax.f32 %v835_v57, %v836_v58 }
 0x246   :  { %1291 = vtanh.f32 %v837_v59 }
 0x24c   :  { %v1292_v60 = vpop.eup %1291 }
 0x24d   :  { %840 = vst.msk [vmem:[%s1863_s9] sm:$0xff] %vm839_vm2, %v1292_v60 }

</bundles_post_ra>
